<compile_context>
chip_gen: v7x
topology: tpu7x:2x2x1
jax: 0.10.0
libtpu: 0.0.40
codegen_flags: <defaults>
</compile_context>

<pallas_src>
import functools

import jax
import jax.numpy as jnp
from jax.experimental import pallas as pl
from jax.experimental.pallas import tpu as pltpu

_MAX_BLOCK_ROWS = 1024          # up to (1024, 512) f32 = 2 MiB per block
_LANE_CANDIDATES = (512, 256, 128)
_BITS_23 = 1 << 23


def _snp_kernel(salt_thr, both_thr, salt, pepper, x_ref, bits_ref, o_ref):
    # 23-bit uniform integer in [0, 2^23) from the raw random bits.
    r = jnp.bitwise_and(bits_ref[...], jnp.uint32(0x7FFFFF)).astype(jnp.int32)
    x = x_ref[...]
    salt_v = jnp.asarray(salt, dtype=x.dtype)
    pepper_v = jnp.asarray(pepper, dtype=x.dtype)
    # r < salt_thr            -> salt
    # salt_thr <= r < both    -> pepper
    # otherwise               -> original pixel (no arithmetic on x)
    o_ref[...] = jnp.where(r < salt_thr, salt_v,
                           jnp.where(r < both_thr, pepper_v, x))


def salt_and_pepper(x, seed, *, salt_prob, pepper_prob, salt=1.0, pepper=0.0):
    """Apply salt & pepper noise to an NCHW tensor via a Pallas TPU kernel."""
    orig_shape = x.shape
    dtype = x.dtype
    total = x.size

    # Integer thresholds on the low 23 random bits.
    salt_thr = int(round(float(salt_prob) * _BITS_23))
    both_thr = int(round((float(salt_prob) + float(pepper_prob)) * _BITS_23))
    salt_thr = max(0, min(salt_thr, _BITS_23))
    both_thr = max(salt_thr, min(both_thr, _BITS_23))

    # Pick the widest lane dimension that divides the element count so no
    # padding / slicing copies are needed (the common case for image tensors).
    lane = None
    for cand in _LANE_CANDIDATES:
        if total % cand == 0:
            lane = cand
            break

    flat = x.reshape(-1)
    padded = total
    if lane is None:
        # Ragged fallback: pad to a multiple of 128 lanes, slice afterwards.
        lane = 128
        padded = pl.cdiv(total, lane) * lane
        flat = jnp.pad(flat, (0, padded - total))

    rows = padded // lane
    slab = flat.reshape(rows, lane)

    # Random bits generated host-side (portable across backends / interpret).
    bits = jax.random.bits(jax.random.PRNGKey(int(seed)), (rows, lane),
                           dtype=jnp.uint32)

    # Block the row dimension: one full-extent block when small, otherwise
    # 1024-row blocks (multiple of 8; Pallas masks the ragged last block).
    if rows <= _MAX_BLOCK_ROWS:
        block_rows = rows
        grid = (1,)
    else:
        block_rows = _MAX_BLOCK_ROWS
        grid = (pl.cdiv(rows, block_rows),)

    kernel = functools.partial(_snp_kernel, salt_thr, both_thr,
                               float(salt), float(pepper))

    out_slab = pl.pallas_call(
        kernel,
        out_shape=jax.ShapeDtypeStruct((rows, lane), dtype),
        grid=grid,
        in_specs=[pl.BlockSpec((block_rows, lane), lambda i: (i, 0)),
                  pl.BlockSpec((block_rows, lane), lambda i: (i, 0))],
        out_specs=pl.BlockSpec((block_rows, lane), lambda i: (i, 0)),
        compiler_params=pltpu.CompilerParams(
            dimension_semantics=("parallel",)),
    )(slab, bits)

    if padded != total:
        return out_slab.reshape(-1)[:total].reshape(orig_shape)
    return out_slab.reshape(orig_shape)


if __name__ == "__main__":
    key = jax.random.PRNGKey(0)
    # NCHW input, matching the PyTorch module's expected image tensors.
    x = jax.random.uniform(key, (2, 4, 16, 16), dtype=jnp.float32,
                           minval=0.1, maxval=0.9)

    salt_prob, pepper_prob = 0.2, 0.2
    y = salt_and_pepper(x, seed=1234,
                        salt_prob=salt_prob, pepper_prob=pepper_prob,
                        salt=1.0, pepper=0.0)
    y = jax.block_until_ready(y)

    # Sanity checks: shape/dtype preserved; every output pixel is either the
    # original value, salt (1.0) or pepper (0.0); noise fraction is plausible.
    assert y.shape == x.shape and y.dtype == x.dtype
    is_salt = (y == 1.0)
    is_pepper = (y == 0.0)
    is_orig = (y == x)
    assert bool(jnp.all(is_salt | is_pepper | is_orig))
    frac_noise = float(jnp.mean(is_salt | is_pepper))
    assert 0.1 < frac_noise < 0.7, f"unexpected noise fraction {frac_noise}"

    print("KERNEL_OK")
</pallas_src>

<mosaic_0001>
module attributes {stable_mosaic.version = 11 : i64} {
  func.func @_snp_kernel(%arg0: i32, %arg1: memref<4x512xf32, #tpu.memory_space<vmem>>, %arg2: memref<4x512xi32, #tpu.memory_space<vmem>>, %arg3: memref<4x512xf32, #tpu.memory_space<vmem>>) attributes {dimension_semantics = [#tpu.dimension_semantics<parallel>], iteration_bounds = array<i64: 1>, scalar_prefetch = 0 : i64, scratch_operands = 0 : i64, tpu.core_type = #tpu.core_type<tc>, window_params = [{transform_indices = @transform_0, window_bounds = array<i64: 4, 512>}, {transform_indices = @transform_1, window_bounds = array<i64: 4, 512>}, {transform_indices = @transform_2, window_bounds = array<i64: 4, 512>}]} {
    %c0 = arith.constant 0 : index
    %c0_0 = arith.constant 0 : index
    %0 = vector.load %arg2[%c0, %c0_0] : memref<4x512xi32, #tpu.memory_space<vmem>>, vector<4x512xi32>
    %c8388607_i32 = arith.constant 8388607 : i32
    %1 = vector.broadcast %c8388607_i32 : i32 to vector<4x512xi32>
    %2 = arith.andi %0, %1 : vector<4x512xi32>
    %c0_1 = arith.constant 0 : index
    %c0_2 = arith.constant 0 : index
    %3 = vector.load %arg1[%c0_1, %c0_2] : memref<4x512xf32, #tpu.memory_space<vmem>>, vector<4x512xf32>
    %c1677722_i32 = arith.constant 1677722 : i32
    %4 = vector.broadcast %c1677722_i32 : i32 to vector<4x512xi32>
    %5 = arith.cmpi slt, %2, %4 : vector<4x512xi32>
    %c3355443_i32 = arith.constant 3355443 : i32
    %6 = vector.broadcast %c3355443_i32 : i32 to vector<4x512xi32>
    %7 = arith.cmpi slt, %2, %6 : vector<4x512xi32>
    %cst = arith.constant 0.000000e+00 : f32
    %8 = vector.broadcast %cst : f32 to vector<4x512xf32>
    %9 = arith.select %7, %8, %3 : vector<4x512xi1>, vector<4x512xf32>
    %cst_3 = arith.constant 1.000000e+00 : f32
    %10 = vector.broadcast %cst_3 : f32 to vector<4x512xf32>
    %11 = arith.select %5, %10, %9 : vector<4x512xi1>, vector<4x512xf32>
    %c0_4 = arith.constant 0 : index
    %c0_5 = arith.constant 0 : index
    %12 = vector.load %arg3[%c0_4, %c0_5] : memref<4x512xf32, #tpu.memory_space<vmem>>, vector<4x512xf32>
    tpu.vector_store %arg3[%c0_4, %c0_5], %11 {strides = array<i32>} : memref<4x512xf32, #tpu.memory_space<vmem>>, vector<4x512xf32>,
    return
  }
  func.func @transform_0(%arg0: i32) -> (i32, i32) {
    %c0_i32 = arith.constant 0 : i32
    %c0_i32_0 = arith.constant 0 : i32
    return %arg0, %c0_i32 : i32, i32
  }
  func.func @transform_1(%arg0: i32) -> (i32, i32) {
    %c0_i32 = arith.constant 0 : i32
    %c0_i32_0 = arith.constant 0 : i32
    return %arg0, %c0_i32 : i32, i32
  }
  func.func @transform_2(%arg0: i32) -> (i32, i32) {
    %c0_i32 = arith.constant 0 : i32
    %c0_i32_0 = arith.constant 0 : i32
    return %arg0, %c0_i32 : i32, i32
  }
}

</mosaic_0001>

<bundles_post_ra>
// kernel: tpu_custom_call.1
= control target key start
LH: loop header
LB: loop body
LE: loop exit
PB: predicated region body
PF: predicated region fallthrough
CT: control target
= control target key end

     0   :  { %7 = vsyncpa [#allocation3], 0  ;;  %s197_s0 = inlined_call_operand.hbm [shape: f32[4,512], index: 0, kind: input, shape index: {}]   ;;  %s198_s1 = inlined_call_operand.hbm [shape: u32[4,512], index: 1, kind: input, shape index: {}]   ;;  %s199_s2 = inlined_call_operand.hbm [shape: f32[4,512], index: 2, kind: output, shape index: {}]  }
   0x1   :  { %8 = vsyncpa [#allocation6], 0 }
   0x2   :  { %9 = vsyncpa [#allocation4], 0  ;;  %s143_s9 = smov [#allocation2]   ;;  %s144_s11 = smov [#allocation5]  }
   0x3   :  { %s16_s10 = sshll.u32 %s143_s9, 4  ;;  %s26_s12 = sshll.u32 %s144_s11, 4  ;;  %s17_s10 = int_to_ptr.vmem [resolvable:$true] %s16_s10  ;;  %s27_s12 = int_to_ptr.vmem [resolvable:$true] %s26_s12 }
   0x4   :  { %s71_s15 = scalar_lea.hbm %s197_s0, 256 }
   0x5   :  { %p72_p0 = scmp.ne.s32.totalorder %s197_s0, %s71_s15  ;;  %p75_p1 = scmp.lt.u32.totalorder %s71_s15, %s197_s0 }
   0x7   :  { %p77_p2 = pnand %p75_p1, %p72_p0 }
   0x9   :  { %80 = shalt.err (!%p77_p2)
}
   0xa   :  { %s81_s20 = scalar_lea.vmem %s17_s10, 256  ;;  %p86_p4 = scmp.lt.s32.totalorder %s17_s10, %s17_s10 }
   0xb   :  { %p82_p3 = scmp.ne.s32.totalorder %s17_s10, %s81_s20  ;;  %p87_p5 = scmp.lt.s32.totalorder %s81_s20, %s81_s20 }
   0xd   :  { %p88_p6 = por %p87_p5, %p86_p4 }
   0xf   :  { %p89_p7 = pnand %p88_p6, %p82_p3 }
  0x11   :  { %92 = shalt.err (!%p89_p7)
}
  0x12   :  { %19 = dma.hbm_to_vmem [thread:$0]  %s197_s0, 256, %s17_s10, [#allocation3]  }
  0x13   :  { %s93_s25 = scalar_lea.hbm %s198_s1, 256 }
  0x14   :  { %p94_p8 = scmp.ne.s32.totalorder %s198_s1, %s93_s25  ;;  %p97_p9 = scmp.lt.u32.totalorder %s93_s25, %s198_s1 }
  0x16   :  { %p99_p10 = pnand %p97_p9, %p94_p8 }
  0x18   :  { %102 = shalt.err (!%p99_p10)
}
  0x19   :  { %s103_s30 = scalar_lea.vmem %s27_s12, 256  ;;  %p108_p12 = scmp.lt.s32.totalorder %s27_s12, %s27_s12 }
  0x1a   :  { %p104_p11 = scmp.ne.s32.totalorder %s27_s12, %s103_s30  ;;  %p109_p13 = scmp.lt.s32.totalorder %s103_s30, %s103_s30 }
  0x1c   :  { %p110_p0 = por %p109_p13, %p108_p12 }
  0x1e   :  { %p111_p1 = pnand %p110_p0, %p104_p11 }
  0x20   :  { %114 = shalt.err (!%p111_p1)
}
  0x21   :  { %29 = dma.hbm_to_vmem [thread:$0]  %s198_s1, 256, %s27_s12, [#allocation6]  }
  0x22   :  { %137 = dma.done.wait [#allocation3], 256  }
  0x23   :  { %138 = vsyncadd [#allocation3], 4294967040 }
  0x24   :  { %139 = dma.done.wait [#allocation6], 256  }
  0x25   :  { %140 = vsyncadd [#allocation6], 4294967040  ;;  %v36_v0 = vld [vmem:[#allocation5] sm:$0xff]  ;;  %v37_v1 = vld [vmem:[#allocation5 + $0x8] sm:$0xff]  ;;  %s145_s4 = smov [#allocation7]  }
  0x26   :  { %v38_v2 = vand.u32 8388607, %v36_v0  ;;  %v40_v3 = vld [vmem:[#allocation2] sm:$0xff]  ;;  %v39_v4 = vand.u32 8388607, %v37_v1  ;;  %v41_v5 = vld [vmem:[#allocation2 + $0x8] sm:$0xff] }
  0x27   :  { %s58_s5 = sshll.u32 %s145_s4, 4  ;;  %s59_s5 = int_to_ptr.vmem [resolvable:$true] %s58_s5 }
  0x28   :  { %vm42_vm0 = vcmp.lt.s32.totalorder %v38_v2, 1677722  ;;  %vm44_vm1 = vcmp.lt.s32.totalorder %v38_v2, 3355443  ;;  %vm43_vm2 = vcmp.lt.s32.totalorder %v39_v4, 1677722  ;;  %p120_p3 = scmp.lt.s32.totalorder %s59_s5, %s59_s5 }
  0x29   :  { %v46_v6 = vsel %vm44_vm1, 0.0, %v40_v3  ;;  %vm45_vm3 = vcmp.lt.s32.totalorder %v39_v4, 3355443  ;;  %s115_s1 = scalar_lea.vmem %s59_s5, 256 }
  0x2a   :  { %v48_v7 = vsel %vm42_vm0, 1.0, %v46_v6  ;;  %v47_v8 = vsel %vm45_vm3, 0.0, %v41_v5  ;;  %p116_p2 = scmp.ne.s32.totalorder %s59_s5, %s115_s1  ;;  %p121_p4 = scmp.lt.s32.totalorder %s115_s1, %s115_s1 }
  0x2b   :  { %50 = vst [vmem:[#allocation7] sm:$0xff] %v48_v7  ;;  %v49_v9 = vsel %vm43_vm2, 1.0, %v47_v8 }
  0x2c   :  { %51 = vst [vmem:[#allocation7 + $0x8] sm:$0xff] %v49_v9  ;;  %p122_p5 = por %p121_p4, %p120_p3 }
  0x2e   :  { %p123_p6 = pnand %p122_p5, %p116_p2 }
  0x30   :  { %126 = shalt.err (!%p123_p6)
}
  0x31   :  { %s127_s8 = scalar_lea.hbm %s199_s2, 256 }
  0x32   :  { %p128_p7 = scmp.ne.s32.totalorder %s199_s2, %s127_s8  ;;  %p131_p8 = scmp.lt.u32.totalorder %s127_s8, %s199_s2 }
  0x34   :  { %p133_p9 = pnand %p131_p8, %p128_p7 }
  0x36   :  { %136 = shalt.err (!%p133_p9)
}
  0x37   :  { %61 = dma.vmem_to_hbm [thread:$0]  %s59_s5, 256, %s199_s2, [#allocation4]  }
  0x38   :  { %141 = dma.done.wait [#allocation4], 256  }
  0x39   :  { %142 = vsyncadd [#allocation4], 4294967040 }
  0x3a   :  { %65 = vsyncpa [#allocation3], 1 }
  0x3b   :  { %66 = vsyncpa [#allocation6], 1 }
  0x3c   :  { %67 = vsyncpa [#allocation4], 1 }

</bundles_post_ra>
